<compile_context>
chip_gen: v5e
topology: v5e:2x2
jax: 0.10.0
libtpu: 0.0.40
codegen_flags: <defaults>
</compile_context>

<pallas_src>
import functools

import jax
import jax.numpy as jnp
from jax.experimental import pallas as pl
from jax.experimental.pallas import tpu as pltpu

LANE = 128


def _round_up(n, m):
    return ((n + m - 1) // m) * m


def _sigmoid(x):
    # exp (EUP) + approx reciprocal (vrcp, separate EUP-cheap op) -> low EUP load.
    return pl.reciprocal(1.0 + jnp.exp(-x), approx=True)


def _silu(x):
    return x * _sigmoid(x)


def _mbconv_kernel(x_ref, w1_ref, bn1s_ref, bn1b_ref,
                   wd_ref, bn2s_ref, bn2b_ref,
                   wse1_ref, bse1_ref, wse2_ref, bse2_ref,
                   w3_ref, bn3s_ref, bn3b_ref,
                   o_ref, *, kernel_size, add_residual):
    Bt, L, Cin = x_ref.shape
    pad = kernel_size // 2
    n_rows = Bt * L

    # (Bt, L, Cin) -> (Bt*L, Cin); layout no-op when L % 8 == 0.
    x = x_ref[...].reshape(n_rows, Cin).astype(jnp.float32)

    # --- expand: 1x1 conv (bf16 MXU, f32 acc) + folded BN + SiLU -------------
    h = jnp.dot(x.astype(jnp.bfloat16), w1_ref[...],
                preferred_element_type=jnp.float32)             # (rows, Hp)
    h = h * bn1s_ref[...] + bn1b_ref[...]
    h = _silu(h)

    # --- depthwise conv (groups=hidden, stride=1, pad=K//2) + BN + SiLU ------
    # TODO(synk): stride > 1 not implemented (module default stride=1).
    wd = wd_ref[...]                                            # (K, Hp), f32
    # Per-row sequence position as a (rows, 1) column: mask arithmetic is
    # O(rows) and broadcasts along lanes inside jnp.where (no (rows, Hp) iota).
    l_col = jax.lax.broadcasted_iota(jnp.int32, (n_rows, 1), 0)
    if Bt > 1:
        l_col = l_col % L
    acc = h * wd[pad:pad + 1]                                   # center tap init
    for k in range(kernel_size):                                # static unroll
        s = k - pad
        if s == 0:
            continue                                            # done at init
        shifted = pltpu.roll(h, shift=(-s) % n_rows, axis=0)    # XLU sublane roll
        # One compare per tap; kills wrap-around across batch/sequence edges.
        valid = (l_col >= -s) if s < 0 else (l_col < (L - s))
        acc = acc + jnp.where(valid, shifted, 0.0) * wd[k:k + 1]
    h2 = acc * bn2s_ref[...] + bn2b_ref[...]
    h2 = _silu(h2)

    # --- squeeze & excitation (per batch element, M = Bt) --------------------
    h2_3d = h2.reshape(Bt, L, -1)
    s_pool = jnp.mean(h2_3d, axis=1)                            # (Bt, Hp)
    z = jnp.dot(s_pool.astype(jnp.bfloat16), wse1_ref[...],
                preferred_element_type=jnp.float32) + bse1_ref[...]
    z = _silu(z)
    y = _sigmoid(jnp.dot(z.astype(jnp.bfloat16), wse2_ref[...],
                         preferred_element_type=jnp.float32) + bse2_ref[...])
    h3 = (h2_3d * y[:, None, :]).reshape(n_rows, -1)

    # --- project: 1x1 conv + folded BN ---------------------------------------
    out = jnp.dot(h3.astype(jnp.bfloat16), w3_ref[...],
                  preferred_element_type=jnp.float32)           # (rows, Cop)
    out = out * bn3s_ref[...] + bn3b_ref[...]

    # TODO(synk): nn.Dropout(0.1) is identity in eval mode; training-mode RNG
    # dropout not implemented.
    if add_residual:
        out = out + x                                           # Cin == Cop here
    o_ref[...] = out.reshape(Bt, L, -1).astype(o_ref.dtype)


def _pad_to(a, shape):
    return jnp.pad(a, [(0, t - s) for s, t in zip(a.shape, shape)])


def _prepare_params(params):
    """Zero-pad hidden/output channel dims to multiples of 128; bf16 matmul weights.

    Padded lanes are exactly zero in every weight / folded-BN bias, so padded
    hidden channels stay identically zero through the whole block and cannot
    leak into real output columns.
    """
    Cin, H = params["w1"].shape
    R = params["wse1"].shape[1]
    Cout = params["w3"].shape[1]
    Hp, Rp, Cop = (_round_up(n, LANE) for n in (H, R, Cout))
    K = params["wd"].shape[0]
    p = {
        "w1":   _pad_to(params["w1"], (Cin, Hp)).astype(jnp.bfloat16),
        "bn1s": _pad_to(params["bn1s"], (1, Hp)),
        "bn1b": _pad_to(params["bn1b"], (1, Hp)),
        "wd":   _pad_to(params["wd"], (K, Hp)),                 # f32, VPU multiply
        "bn2s": _pad_to(params["bn2s"], (1, Hp)),
        "bn2b": _pad_to(params["bn2b"], (1, Hp)),
        "wse1": _pad_to(params["wse1"], (Hp, Rp)).astype(jnp.bfloat16),
        "bse1": _pad_to(params["bse1"], (1, Rp)),
        "wse2": _pad_to(params["wse2"], (Rp, Hp)).astype(jnp.bfloat16),
        "bse2": _pad_to(params["bse2"], (1, Hp)),
        "w3":   _pad_to(params["w3"], (Hp, Cop)).astype(jnp.bfloat16),
        "bn3s": _pad_to(params["bn3s"], (1, Cop)),
        "bn3b": _pad_to(params["bn3b"], (1, Cop)),
    }
    return p, (Hp, Rp, Cop)


def mbconv_forward(x, params, *, kernel_size, use_residual):
    B, L, Cin = x.shape
    Cout = params["w3"].shape[1]
    pp, (Hp, Rp, Cop) = _prepare_params(params)

    # Generation-aware VMEM budget: ~half of physical per-core VMEM
    # (32 MiB on v7x's 64 MiB, 64 MiB on v5e/v6e's 128 MiB).
    try:
        vmem_cap = int(getattr(pltpu.get_tpu_info(), "vmem_capacity_bytes", 64 << 20))
    except Exception:
        vmem_cap = 64 << 20
    vmem_limit = int(max(32 << 20, min(vmem_cap // 2, 96 << 20)))

    # Per-step sizing: target 512-1024 matmul rows, capped by an estimate of
    # live f32 intermediates (~10 arrays of rows*Hp), and keep >= 2 grid steps
    # whenever B >= 2 so both TensorCores get work on v7x.
    max_rows_vmem = max(8, (vmem_limit // 2) // (10 * Hp * 4))
    target_rows = min(1024, max_rows_vmem)
    bt = max(1, min(B, target_rows // max(L, 1)))
    if B >= 2:
        bt = min(bt, B // 2)
    while B % bt:                                   # keep the grid exact
        bt -= 1
    grid = (B // bt,)

    # Residual add happens in-kernel only when x is already lane-dense
    # (Cin % 128 == 0, hence Cin == Cop); otherwise it fuses with the de-pad
    # slice in the wrapper (one XLA pass, no extra traffic vs. the slice alone).
    add_residual_in_kernel = use_residual and (Cin % LANE == 0)

    def full_spec(a):
        nd = a.ndim
        return pl.BlockSpec(a.shape, lambda b, _nd=nd: (0,) * _nd)

    ordered = [pp["w1"], pp["bn1s"], pp["bn1b"],
               pp["wd"], pp["bn2s"], pp["bn2b"],
               pp["wse1"], pp["bse1"], pp["wse2"], pp["bse2"],
               pp["w3"], pp["bn3s"], pp["bn3b"]]
    # TODO(synk): single-buffer the 13 constant weight inputs
    # (pipeline_mode=pl.Buffered(1)) to reclaim their second VMEM buffer.
    # TODO(synk): L-tiled halo path for very long sequences (rows*Hp f32
    # intermediates must fit the v7x 64 MiB VMEM).

    kernel = functools.partial(_mbconv_kernel, kernel_size=kernel_size,
                               add_residual=add_residual_in_kernel)
    out_p = pl.pallas_call(
        kernel,
        out_shape=jax.ShapeDtypeStruct((B, L, Cop), x.dtype),
        grid=grid,
        in_specs=[pl.BlockSpec((bt, L, Cin), lambda b: (b, 0, 0))]  # real Cin lanes
                 + [full_spec(a) for a in ordered],
        out_specs=pl.BlockSpec((bt, L, Cop), lambda b: (b, 0, 0)),  # lane-dense
        compiler_params=pltpu.CompilerParams(
            dimension_semantics=("parallel",),      # batch tiles independent
            vmem_limit_bytes=vmem_limit),
    )(x, *ordered)

    if Cop == Cout:
        return out_p                                # no de-pad pass needed
    out = out_p[:, :, :Cout]
    if use_residual and not add_residual_in_kernel:
        out = out + x                               # fuses with the slice in XLA
    return out


def init_params(key, in_channels, out_channels, kernel_size,
                expand_ratio=6, reduction=16, eps=1e-5):
    hidden = in_channels * expand_ratio
    red = max(hidden // reduction, 1)
    ks = iter(jax.random.split(key, 32))

    def bn_fold(n):
        gamma = 1.0 + 0.1 * jax.random.normal(next(ks), (n,), jnp.float32)
        beta = 0.1 * jax.random.normal(next(ks), (n,), jnp.float32)
        mean = 0.1 * jax.random.normal(next(ks), (n,), jnp.float32)
        var = jax.nn.softplus(jax.random.normal(next(ks), (n,), jnp.float32)) + 0.1
        scale = gamma / jnp.sqrt(var + eps)
        bias = beta - mean * scale
        return scale.reshape(1, n), bias.reshape(1, n)

    p = {}
    # expand 1x1 conv weight: PyTorch (hidden, in, 1) -> ours (in, hidden)
    p["w1"] = 0.1 * jax.random.normal(next(ks), (in_channels, hidden), jnp.float32)
    p["bn1s"], p["bn1b"] = bn_fold(hidden)
    # depthwise weight: PyTorch (hidden, 1, K) -> ours (K, hidden)
    p["wd"] = 0.1 * jax.random.normal(next(ks), (kernel_size, hidden), jnp.float32)
    p["bn2s"], p["bn2b"] = bn_fold(hidden)
    # SE linears (with bias, like nn.Linear defaults)
    p["wse1"] = 0.1 * jax.random.normal(next(ks), (hidden, red), jnp.float32)
    p["bse1"] = 0.1 * jax.random.normal(next(ks), (1, red), jnp.float32)
    p["wse2"] = 0.1 * jax.random.normal(next(ks), (red, hidden), jnp.float32)
    p["bse2"] = 0.1 * jax.random.normal(next(ks), (1, hidden), jnp.float32)
    # project 1x1 conv weight: PyTorch (out, hidden, 1) -> ours (hidden, out)
    p["w3"] = 0.1 * jax.random.normal(next(ks), (hidden, out_channels), jnp.float32)
    p["bn3s"], p["bn3b"] = bn_fold(out_channels)
    return p


def reference(x, p, kernel_size, use_residual):
    """Pure-JAX fp32 reference for correctness checking (unpadded params)."""
    B, L, _ = x.shape
    pad = kernel_size // 2
    h = jnp.einsum("blc,ch->blh", x, p["w1"])
    h = h * p["bn1s"] + p["bn1b"]
    h = h * jax.nn.sigmoid(h)
    hp = jnp.pad(h, ((0, 0), (pad, pad), (0, 0)))
    acc = sum(hp[:, k:k + L, :] * p["wd"][k] for k in range(kernel_size))
    h2 = acc * p["bn2s"] + p["bn2b"]
    h2 = h2 * jax.nn.sigmoid(h2)
    s = h2.mean(axis=1, keepdims=True)
    z = jnp.einsum("bli,ir->blr", s, p["wse1"]) + p["bse1"]
    z = z * jax.nn.sigmoid(z)
    y = jax.nn.sigmoid(jnp.einsum("blr,rh->blh", z, p["wse2"]) + p["bse2"])
    h3 = h2 * y
    out = jnp.einsum("blh,ho->blo", h3, p["w3"]) * p["bn3s"] + p["bn3b"]
    if use_residual:
        out = out + x
    return out


if __name__ == "__main__":
    B, Cin, Cout, L = 2, 16, 16, 16
    kernel_size, stride, expand_ratio = 3, 1, 6
    use_residual = (stride == 1 and Cin == Cout)

    key = jax.random.PRNGKey(0)
    kx, kp = jax.random.split(key)
    x = jax.random.normal(kx, (B, L, Cin), jnp.float32)   # (B, L, C) layout
    params = init_params(kp, Cin, Cout, kernel_size, expand_ratio)

    out = mbconv_forward(x, params, kernel_size=kernel_size,
                         use_residual=use_residual)
    out = jax.block_until_ready(out)

    ref = reference(x, params, kernel_size, use_residual)
    assert out.shape == (B, L, Cout)
    # bf16 MXU inputs (f32 acc) + approx-reciprocal sigmoid -> ~1% error budget.
    assert jnp.allclose(out, ref, rtol=3e-2, atol=3e-2), "mismatch vs reference"
    print("KERNEL_OK")
</pallas_src>

<mosaic_0001>
module attributes {stable_mosaic.version = 11 : i64} {
  func.func @_mbconv_kernel(%arg0: i32, %arg1: memref<1x16x16xf32, #tpu.memory_space<vmem>>, %arg2: memref<16x128xbf16, #tpu.memory_space<vmem>>, %arg3: memref<1x128xf32, #tpu.memory_space<vmem>>, %arg4: memref<1x128xf32, #tpu.memory_space<vmem>>, %arg5: memref<3x128xf32, #tpu.memory_space<vmem>>, %arg6: memref<1x128xf32, #tpu.memory_space<vmem>>, %arg7: memref<1x128xf32, #tpu.memory_space<vmem>>, %arg8: memref<128x128xbf16, #tpu.memory_space<vmem>>, %arg9: memref<1x128xf32, #tpu.memory_space<vmem>>, %arg10: memref<128x128xbf16, #tpu.memory_space<vmem>>, %arg11: memref<1x128xf32, #tpu.memory_space<vmem>>, %arg12: memref<128x128xbf16, #tpu.memory_space<vmem>>, %arg13: memref<1x128xf32, #tpu.memory_space<vmem>>, %arg14: memref<1x128xf32, #tpu.memory_space<vmem>>, %arg15: memref<1x16x128xf32, #tpu.memory_space<vmem>>) attributes {dimension_semantics = [#tpu.dimension_semantics<parallel>], iteration_bounds = array<i64: 2>, scalar_prefetch = 0 : i64, scratch_operands = 0 : i64, tpu.core_type = #tpu.core_type<tc>, window_params = [{transform_indices = @transform_0, window_bounds = array<i64: 1, 16, 16>}, {pipeline_mode = #tpu.pipeline_mode<synchronous>, transform_indices = @transform_1, window_bounds = array<i64: 16, 128>}, {pipeline_mode = #tpu.pipeline_mode<synchronous>, transform_indices = @transform_2, window_bounds = array<i64: 1, 128>}, {pipeline_mode = #tpu.pipeline_mode<synchronous>, transform_indices = @transform_3, window_bounds = array<i64: 1, 128>}, {pipeline_mode = #tpu.pipeline_mode<synchronous>, transform_indices = @transform_4, window_bounds = array<i64: 3, 128>}, {pipeline_mode = #tpu.pipeline_mode<synchronous>, transform_indices = @transform_5, window_bounds = array<i64: 1, 128>}, {pipeline_mode = #tpu.pipeline_mode<synchronous>, transform_indices = @transform_6, window_bounds = array<i64: 1, 128>}, {pipeline_mode = #tpu.pipeline_mode<synchronous>, transform_indices = @transform_7, window_bounds = array<i64: 128, 128>}, {pipeline_mode = #tpu.pipeline_mode<synchronous>, transform_indices = @transform_8, window_bounds = array<i64: 1, 128>}, {pipeline_mode = #tpu.pipeline_mode<synchronous>, transform_indices = @transform_9, window_bounds = array<i64: 128, 128>}, {pipeline_mode = #tpu.pipeline_mode<synchronous>, transform_indices = @transform_10, window_bounds = array<i64: 1, 128>}, {pipeline_mode = #tpu.pipeline_mode<synchronous>, transform_indices = @transform_11, window_bounds = array<i64: 128, 128>}, {pipeline_mode = #tpu.pipeline_mode<synchronous>, transform_indices = @transform_12, window_bounds = array<i64: 1, 128>}, {pipeline_mode = #tpu.pipeline_mode<synchronous>, transform_indices = @transform_13, window_bounds = array<i64: 1, 128>}, {transform_indices = @transform_14, window_bounds = array<i64: 1, 16, 128>}]} {
    %c0 = arith.constant 0 : index
    %c0_0 = arith.constant 0 : index
    %c0_1 = arith.constant 0 : index
    %0 = vector.load %arg1[%c0, %c0_0, %c0_1] : memref<1x16x16xf32, #tpu.memory_space<vmem>>, vector<1x16x16xf32>
    %1 = vector.shape_cast %0 : vector<1x16x16xf32> to vector<16x16xf32>
    %2 = arith.truncf %1 : vector<16x16xf32> to vector<16x16xbf16>
    %c0_2 = arith.constant 0 : index
    %c0_3 = arith.constant 0 : index
    %3 = vector.load %arg2[%c0_2, %c0_3] : memref<16x128xbf16, #tpu.memory_space<vmem>>, vector<16x128xbf16>
    %cst = arith.constant dense<0.000000e+00> : vector<16x128xf32>
    %4 = tpu.matmul %2, %3, %cst {dimension_numbers = #tpu.dot_dimension_numbers<[1], [0], [0], [1], [0, 0, 1, 1], [], []>} : vector<16x16xbf16>, vector<16x128xbf16>, vector<16x128xf32> -> vector<16x128xf32>
    %c0_4 = arith.constant 0 : index
    %c0_5 = arith.constant 0 : index
    %5 = vector.load %arg3[%c0_4, %c0_5] : memref<1x128xf32, #tpu.memory_space<vmem>>, vector<1x128xf32>
    %6 = vector.broadcast %5 : vector<1x128xf32> to vector<16x128xf32>
    %7 = arith.mulf %4, %6 : vector<16x128xf32>
    %c0_6 = arith.constant 0 : index
    %c0_7 = arith.constant 0 : index
    %8 = vector.load %arg4[%c0_6, %c0_7] : memref<1x128xf32, #tpu.memory_space<vmem>>, vector<1x128xf32>
    %9 = vector.broadcast %8 : vector<1x128xf32> to vector<16x128xf32>
    %10 = arith.addf %7, %9 : vector<16x128xf32>
    %cst_8 = arith.constant 0.000000e+00 : f32
    %11 = vector.broadcast %cst_8 : f32 to vector<16x128xf32>
    %12 = arith.subf %11, %10 : vector<16x128xf32>
    %13 = math.exp %12 : vector<16x128xf32>
    %cst_9 = arith.constant 1.000000e+00 : f32
    %14 = vector.broadcast %cst_9 : f32 to vector<16x128xf32>
    %15 = arith.addf %14, %13 : vector<16x128xf32>
    %16 = tpu.reciprocal %15 {approx = true} : vector<16x128xf32> -> vector<16x128xf32>
    %17 = arith.mulf %10, %16 : vector<16x128xf32>
    %c0_10 = arith.constant 0 : index
    %c0_11 = arith.constant 0 : index
    %18 = vector.load %arg5[%c0_10, %c0_11] : memref<3x128xf32, #tpu.memory_space<vmem>>, vector<3x128xf32>
    %19 = tpu.iota {dimensions = array<i32: 0>} : vector<16x1xi32>
    %20 = vector.extract_strided_slice %18 {offsets = [1, 0], sizes = [1, 128], strides = [1, 1]} : vector<3x128xf32> to vector<1x128xf32>
    %21 = vector.broadcast %20 : vector<1x128xf32> to vector<16x128xf32>
    %22 = arith.mulf %17, %21 : vector<16x128xf32>
    %c1_i32 = arith.constant 1 : i32
    %23 = tpu.dynamic_rotate %17 by %c1_i32 dim 0 : vector<16x128xf32>, i32 -> vector<16x128xf32>
    %c1_i32_12 = arith.constant 1 : i32
    %24 = vector.broadcast %c1_i32_12 : i32 to vector<16x1xi32>
    %25 = arith.cmpi sge, %19, %24 : vector<16x1xi32>
    %cst_13 = arith.constant 0.000000e+00 : f32
    %26 = vector.shape_cast %25 : vector<16x1xi1> to vector<16x1xi1>
    %27 = vector.broadcast %26 : vector<16x1xi1> to vector<16x128xi1>
    %28 = vector.broadcast %cst_13 : f32 to vector<16x128xf32>
    %29 = arith.select %27, %23, %28 : vector<16x128xi1>, vector<16x128xf32>
    %30 = vector.extract_strided_slice %18 {offsets = [0, 0], sizes = [1, 128], strides = [1, 1]} : vector<3x128xf32> to vector<1x128xf32>
    %31 = vector.broadcast %30 : vector<1x128xf32> to vector<16x128xf32>
    %32 = arith.mulf %29, %31 : vector<16x128xf32>
    %33 = arith.addf %22, %32 : vector<16x128xf32>
    %c15_i32 = arith.constant 15 : i32
    %34 = tpu.dynamic_rotate %17 by %c15_i32 dim 0 : vector<16x128xf32>, i32 -> vector<16x128xf32>
    %c15_i32_14 = arith.constant 15 : i32
    %35 = vector.broadcast %c15_i32_14 : i32 to vector<16x1xi32>
    %36 = arith.cmpi slt, %19, %35 : vector<16x1xi32>
    %cst_15 = arith.constant 0.000000e+00 : f32
    %37 = vector.shape_cast %36 : vector<16x1xi1> to vector<16x1xi1>
    %38 = vector.broadcast %37 : vector<16x1xi1> to vector<16x128xi1>
    %39 = vector.broadcast %cst_15 : f32 to vector<16x128xf32>
    %40 = arith.select %38, %34, %39 : vector<16x128xi1>, vector<16x128xf32>
    %41 = vector.extract_strided_slice %18 {offsets = [2, 0], sizes = [1, 128], strides = [1, 1]} : vector<3x128xf32> to vector<1x128xf32>
    %42 = vector.broadcast %41 : vector<1x128xf32> to vector<16x128xf32>
    %43 = arith.mulf %40, %42 : vector<16x128xf32>
    %44 = arith.addf %33, %43 : vector<16x128xf32>
    %c0_16 = arith.constant 0 : index
    %c0_17 = arith.constant 0 : index
    %45 = vector.load %arg6[%c0_16, %c0_17] : memref<1x128xf32, #tpu.memory_space<vmem>>, vector<1x128xf32>
    %46 = vector.broadcast %45 : vector<1x128xf32> to vector<16x128xf32>
    %47 = arith.mulf %44, %46 : vector<16x128xf32>
    %c0_18 = arith.constant 0 : index
    %c0_19 = arith.constant 0 : index
    %48 = vector.load %arg7[%c0_18, %c0_19] : memref<1x128xf32, #tpu.memory_space<vmem>>, vector<1x128xf32>
    %49 = vector.broadcast %48 : vector<1x128xf32> to vector<16x128xf32>
    %50 = arith.addf %47, %49 : vector<16x128xf32>
    %cst_20 = arith.constant 0.000000e+00 : f32
    %51 = vector.broadcast %cst_20 : f32 to vector<16x128xf32>
    %52 = arith.subf %51, %50 : vector<16x128xf32>
    %53 = math.exp %52 : vector<16x128xf32>
    %cst_21 = arith.constant 1.000000e+00 : f32
    %54 = vector.broadcast %cst_21 : f32 to vector<16x128xf32>
    %55 = arith.addf %54, %53 : vector<16x128xf32>
    %56 = tpu.reciprocal %55 {approx = true} : vector<16x128xf32> -> vector<16x128xf32>
    %57 = arith.mulf %50, %56 : vector<16x128xf32>
    %58 = vector.shape_cast %57 : vector<16x128xf32> to vector<1x16x128xf32>
    %cst_22 = arith.constant dense<0.000000e+00> : vector<1x128xf32>
    %59 = vector.multi_reduction <add>, %58, %cst_22 [1] : vector<1x16x128xf32> to vector<1x128xf32>
    %cst_23 = arith.constant 1.600000e+01 : f32
    %60 = vector.broadcast %cst_23 : f32 to vector<1x128xf32>
    %61 = arith.divf %59, %60 : vector<1x128xf32>
    %62 = arith.truncf %61 : vector<1x128xf32> to vector<1x128xbf16>
    %c0_24 = arith.constant 0 : index
    %c0_25 = arith.constant 0 : index
    %63 = vector.load %arg8[%c0_24, %c0_25] : memref<128x128xbf16, #tpu.memory_space<vmem>>, vector<128x128xbf16>
    %cst_26 = arith.constant dense<0.000000e+00> : vector<1x128xf32>
    %64 = tpu.matmul %62, %63, %cst_26 {dimension_numbers = #tpu.dot_dimension_numbers<[1], [0], [0], [1], [0, 0, 1, 1], [], []>} : vector<1x128xbf16>, vector<128x128xbf16>, vector<1x128xf32> -> vector<1x128xf32>
    %c0_27 = arith.constant 0 : index
    %c0_28 = arith.constant 0 : index
    %65 = vector.load %arg9[%c0_27, %c0_28] : memref<1x128xf32, #tpu.memory_space<vmem>>, vector<1x128xf32>
    %66 = arith.addf %64, %65 : vector<1x128xf32>
    %cst_29 = arith.constant 0.000000e+00 : f32
    %67 = vector.broadcast %cst_29 : f32 to vector<1x128xf32>
    %68 = arith.subf %67, %66 : vector<1x128xf32>
    %69 = math.exp %68 : vector<1x128xf32>
    %cst_30 = arith.constant 1.000000e+00 : f32
    %70 = vector.broadcast %cst_30 : f32 to vector<1x128xf32>
    %71 = arith.addf %70, %69 : vector<1x128xf32>
    %72 = tpu.reciprocal %71 {approx = true} : vector<1x128xf32> -> vector<1x128xf32>
    %73 = arith.mulf %66, %72 : vector<1x128xf32>
    %74 = arith.truncf %73 : vector<1x128xf32> to vector<1x128xbf16>
    %c0_31 = arith.constant 0 : index
    %c0_32 = arith.constant 0 : index
    %75 = vector.load %arg10[%c0_31, %c0_32] : memref<128x128xbf16, #tpu.memory_space<vmem>>, vector<128x128xbf16>
    %cst_33 = arith.constant dense<0.000000e+00> : vector<1x128xf32>
    %76 = tpu.matmul %74, %75, %cst_33 {dimension_numbers = #tpu.dot_dimension_numbers<[1], [0], [0], [1], [0, 0, 1, 1], [], []>} : vector<1x128xbf16>, vector<128x128xbf16>, vector<1x128xf32> -> vector<1x128xf32>
    %c0_34 = arith.constant 0 : index
    %c0_35 = arith.constant 0 : index
    %77 = vector.load %arg11[%c0_34, %c0_35] : memref<1x128xf32, #tpu.memory_space<vmem>>, vector<1x128xf32>
    %78 = arith.addf %76, %77 : vector<1x128xf32>
    %cst_36 = arith.constant 0.000000e+00 : f32
    %79 = vector.broadcast %cst_36 : f32 to vector<1x128xf32>
    %80 = arith.subf %79, %78 : vector<1x128xf32>
    %81 = math.exp %80 : vector<1x128xf32>
    %cst_37 = arith.constant 1.000000e+00 : f32
    %82 = vector.broadcast %cst_37 : f32 to vector<1x128xf32>
    %83 = arith.addf %82, %81 : vector<1x128xf32>
    %84 = tpu.reciprocal %83 {approx = true} : vector<1x128xf32> -> vector<1x128xf32>
    %85 = vector.shape_cast %84 : vector<1x128xf32> to vector<1x1x128xf32>
    %86 = vector.broadcast %85 : vector<1x1x128xf32> to vector<1x16x128xf32>
    %87 = arith.mulf %58, %86 : vector<1x16x128xf32>
    %88 = vector.shape_cast %87 : vector<1x16x128xf32> to vector<16x128xf32>
    %89 = arith.truncf %88 : vector<16x128xf32> to vector<16x128xbf16>
    %c0_38 = arith.constant 0 : index
    %c0_39 = arith.constant 0 : index
    %90 = vector.load %arg12[%c0_38, %c0_39] : memref<128x128xbf16, #tpu.memory_space<vmem>>, vector<128x128xbf16>
    %cst_40 = arith.constant dense<0.000000e+00> : vector<16x128xf32>
    %91 = tpu.matmul %89, %90, %cst_40 {dimension_numbers = #tpu.dot_dimension_numbers<[1], [0], [0], [1], [0, 0, 1, 1], [], []>} : vector<16x128xbf16>, vector<128x128xbf16>, vector<16x128xf32> -> vector<16x128xf32>
    %c0_41 = arith.constant 0 : index
    %c0_42 = arith.constant 0 : index
    %92 = vector.load %arg13[%c0_41, %c0_42] : memref<1x128xf32, #tpu.memory_space<vmem>>, vector<1x128xf32>
    %93 = vector.broadcast %92 : vector<1x128xf32> to vector<16x128xf32>
    %94 = arith.mulf %91, %93 : vector<16x128xf32>
    %c0_43 = arith.constant 0 : index
    %c0_44 = arith.constant 0 : index
    %95 = vector.load %arg14[%c0_43, %c0_44] : memref<1x128xf32, #tpu.memory_space<vmem>>, vector<1x128xf32>
    %96 = vector.broadcast %95 : vector<1x128xf32> to vector<16x128xf32>
    %97 = arith.addf %94, %96 : vector<16x128xf32>
    %98 = vector.shape_cast %97 : vector<16x128xf32> to vector<1x16x128xf32>
    %c0_45 = arith.constant 0 : index
    %c0_46 = arith.constant 0 : index
    %c0_47 = arith.constant 0 : index
    %99 = vector.load %arg15[%c0_45, %c0_46, %c0_47] : memref<1x16x128xf32, #tpu.memory_space<vmem>>, vector<1x16x128xf32>
    tpu.vector_store %arg15[%c0_45, %c0_46, %c0_47], %98 {strides = array<i32>} : memref<1x16x128xf32, #tpu.memory_space<vmem>>, vector<1x16x128xf32>,
    return
  }
  func.func @transform_0(%arg0: i32) -> (i32, i32, i32) {
    %c0_i32 = arith.constant 0 : i32
    %c0_i32_0 = arith.constant 0 : i32
    %c0_i32_1 = arith.constant 0 : i32
    return %arg0, %c0_i32, %c0_i32_0 : i32, i32, i32
  }
  func.func @transform_1(%arg0: i32) -> (i32, i32) {
    %c0_i32 = arith.constant 0 : i32
    %c0_i32_0 = arith.constant 0 : i32
    %c0_i32_1 = arith.constant 0 : i32
    return %c0_i32, %c0_i32_0 : i32, i32
  }
  func.func @transform_2(%arg0: i32) -> (i32, i32) {
    %c0_i32 = arith.constant 0 : i32
    %c0_i32_0 = arith.constant 0 : i32
    %c0_i32_1 = arith.constant 0 : i32
    return %c0_i32, %c0_i32_0 : i32, i32
  }
  func.func @transform_3(%arg0: i32) -> (i32, i32) {
    %c0_i32 = arith.constant 0 : i32
    %c0_i32_0 = arith.constant 0 : i32
    %c0_i32_1 = arith.constant 0 : i32
    return %c0_i32, %c0_i32_0 : i32, i32
  }
  func.func @transform_4(%arg0: i32) -> (i32, i32) {
    %c0_i32 = arith.constant 0 : i32
    %c0_i32_0 = arith.constant 0 : i32
    %c0_i32_1 = arith.constant 0 : i32
    return %c0_i32, %c0_i32_0 : i32, i32
  }
  func.func @transform_5(%arg0: i32) -> (i32, i32) {
    %c0_i32 = arith.constant 0 : i32
    %c0_i32_0 = arith.constant 0 : i32
    %c0_i32_1 = arith.constant 0 : i32
    return %c0_i32, %c0_i32_0 : i32, i32
  }
  func.func @transform_6(%arg0: i32) -> (i32, i32) {
    %c0_i32 = arith.constant 0 : i32
    %c0_i32_0 = arith.constant 0 : i32
    %c0_i32_1 = arith.constant 0 : i32
    return %c0_i32, %c0_i32_0 : i32, i32
  }
  func.func @transform_7(%arg0: i32) -> (i32, i32) {
    %c0_i32 = arith.constant 0 : i32
    %c0_i32_0 = arith.constant 0 : i32
    %c0_i32_1 = arith.constant 0 : i32
    return %c0_i32, %c0_i32_0 : i32, i32
  }
  func.func @transform_8(%arg0: i32) -> (i32, i32) {
    %c0_i32 = arith.constant 0 : i32
    %c0_i32_0 = arith.constant 0 : i32
    %c0_i32_1 = arith.constant 0 : i32
    return %c0_i32, %c0_i32_0 : i32, i32
  }
  func.func @transform_9(%arg0: i32) -> (i32, i32) {
    %c0_i32 = arith.constant 0 : i32
    %c0_i32_0 = arith.constant 0 : i32
    %c0_i32_1 = arith.constant 0 : i32
    return %c0_i32, %c0_i32_0 : i32, i32
  }
  func.func @transform_10(%arg0: i32) -> (i32, i32) {
    %c0_i32 = arith.constant 0 : i32
    %c0_i32_0 = arith.constant 0 : i32
    %c0_i32_1 = arith.constant 0 : i32
    return %c0_i32, %c0_i32_0 : i32, i32
  }
  func.func @transform_11(%arg0: i32) -> (i32, i32) {
    %c0_i32 = arith.constant 0 : i32
    %c0_i32_0 = arith.constant 0 : i32
    %c0_i32_1 = arith.constant 0 : i32
    return %c0_i32, %c0_i32_0 : i32, i32
  }
  func.func @transform_12(%arg0: i32) -> (i32, i32) {
    %c0_i32 = arith.constant 0 : i32
    %c0_i32_0 = arith.constant 0 : i32
    %c0_i32_1 = arith.constant 0 : i32
    return %c0_i32, %c0_i32_0 : i32, i32
  }
  func.func @transform_13(%arg0: i32) -> (i32, i32) {
    %c0_i32 = arith.constant 0 : i32
    %c0_i32_0 = arith.constant 0 : i32
    %c0_i32_1 = arith.constant 0 : i32
    return %c0_i32, %c0_i32_0 : i32, i32
  }
  func.func @transform_14(%arg0: i32) -> (i32, i32, i32) {
    %c0_i32 = arith.constant 0 : i32
    %c0_i32_0 = arith.constant 0 : i32
    %c0_i32_1 = arith.constant 0 : i32
    return %arg0, %c0_i32, %c0_i32_0 : i32, i32, i32
  }
}

</mosaic_0001>

<bundles_post_ra>
// kernel: tpu_custom_call.1
= control target key start
LH: loop header
LB: loop body
LE: loop exit
PB: predicated region body
PF: predicated region fallthrough
CT: control target
= control target key end

     0   :  { %s1954_s0 = inlined_call_operand.hbm [shape: f32[2,16,16], index: 0, kind: input, shape index: {}]   ;;  %s1955_s1 = inlined_call_operand.hbm [shape: bf16[16,128], index: 1, kind: input, shape index: {}]   ;;  %s1956_s2 = inlined_call_operand.vmem [shape: f32[1,128], index: 2, kind: input, shape index: {}]   ;;  %s1957_s3 = inlined_call_operand.vmem [shape: f32[1,128], index: 3, kind: input, shape index: {}]   ;;  %s1958_s4 = inlined_call_operand.hbm [shape: f32[3,128], index: 4, kind: input, shape index: {}]   ;;  %s1959_s5 = inlined_call_operand.vmem [shape: f32[1,128], index: 5, kind: input, shape index: {}]   ;;  %s1960_s6 = inlined_call_operand.vmem [shape: f32[1,128], index: 6, kind: input, shape index: {}]   ;;  %s1961_s7 = inlined_call_operand.hbm [shape: bf16[128,128], index: 7, kind: input, shape index: {}]   ;;  %s1962_s8 = inlined_call_operand.vmem [shape: f32[1,128], index: 8, kind: input, shape index: {}]   ;;  %s1963_s9 = inlined_call_operand.hbm [shape: bf16[128,128], index: 9, kind: input, shape index: {}]   ;;  %s1964_s10 = inlined_call_operand.vmem [shape: f32[1,128], index: 10, kind: input, shape index: {}]   ;;  %s1965_s11 = inlined_call_operand.hbm [shape: bf16[128,128], index: 11, kind: input, shape index: {}]   ;;  %s1966_s12 = inlined_call_operand.vmem [shape: f32[1,128], index: 12, kind: input, shape index: {}]   ;;  %s1967_s13 = inlined_call_operand.vmem [shape: f32[1,128], index: 13, kind: input, shape index: {}]   ;;  %s1968_s14 = inlined_call_operand.hbm [shape: f32[2,16,128], index: 14, kind: output, shape index: {}]  }
   0x1   :  { %1970 = sst [smem:[#allocation20_spill]] %s1955_s1 }
   0x2   :  { %1971 = sst [smem:[#allocation21_spill]] %s1958_s4 }
   0x3   :  { %1972 = sst [smem:[#allocation22_spill]] %s1961_s7 }
   0x4   :  { %1973 = sst [smem:[#allocation23_spill]] %s1963_s9 }
   0x5   :  { %1974 = sst [smem:[#allocation24_spill]] %s1965_s11 }
   0x6   :  { %1975 = sst [smem:[#allocation25_spill]] %s1966_s12 }
   0x7   :  { %1976 = sst [smem:[#allocation26_spill]] %s1967_s13 }
   0x8   :  { %1977 = sst [smem:[#allocation27_spill]] %s1968_s14 }
   0x9   :  { %19 = vsyncpa [#allocation3], 0 }
   0xa   :  { %21 = vsyncpa [#allocation3 + $0x1], 0 }
   0xb   :  { %22 = vsyncpa [#allocation6], 0 }
   0xc   :  { %23 = vsyncpa [#allocation9], 0 }
   0xd   :  { %24 = vsyncpa [#allocation12], 0 }
   0xe   :  { %25 = vsyncpa [#allocation4], 0 }
   0xf   :  { %27 = vsyncpa [#allocation4 + $0x1], 0  ;;  %s1742_s29 = smov 0   ;;  %s1744_s30 = smov 0  }
  0x10   :  { %s1746_s15 = smov 0   ;;  %s1748_s16 = smov 0  }
  0x11 LB: > { %s1978_s1 = sld [smem:[#allocation20_spill]]  ;;  %s1766_s20 = sadd.s32 4294967295, %s1653_s16   ;;  %s1653_s16 = sphi %s1748_s16, %s1999_s16   ;;  %s1649_s15 = sphi %s1746_s15, %s1998_s15   ;;  %s1645_s30 = sphi %s1744_s30, %s1997_s30   ;;  %s1641_s29 = sphi %s1742_s29, %s1996_s29  }
  0x12   : > { %p1108_p0 = scmp.ge.s32.totalorder %s1653_s16, 1  ;;  %p54_p1 = scmp.eq.s32.totalorder %s1766_s20, 0 }
  0x13   : > { %p363_p2 = scmp.lt.s32.totalorder %s1653_s16, 3  ;;  %s1655_s22 = smov [#allocation5]  }
  0x14   : > { %s376_s23 = sshll.u32 %s1655_s22, 4  ;;  %s1980_s7 = sld [smem:[#allocation22_spill]]  ;;  %s377_s23 = int_to_ptr.vmem [resolvable:$true] %s376_s23 }
  0x15   : > { %p1771_p3 = pnand %p1108_p0, %p363_p2  ;;  %s1982_s4 = sld [smem:[#allocation21_spill]] }
  0x16   : > { %s1656_s22 = smov [#allocation8]   ;;  %s1657_s14 = smov 64  }
  0x17   : > { %s374_s19 = sshll.u32 %s1978_s1, 4  ;;  %p1283_p4 = pneg %p1771_p3  ;;  %s375_s19 = int_to_ptr.hbm [resolvable:$true] %s374_s19 }
  0x18   : > { %s414_s1 = sshll.u32 %s1656_s22, 4  ;;  %s1658_s13 = smov 4   ;;  %s415_s1 = int_to_ptr.vmem [resolvable:$true] %s414_s1 }
  0x19   : > { %p1783_p6 = pnand %p1283_p4, %p54_p1  ;;  %s1983_s9 = sld [smem:[#allocation23_spill]] }
  0x1a   : > { %s412_s26 = sshll.u32 %s1980_s7, 4  ;;  %s1659_s12 = smov [#allocation7]   ;;  %s413_s26 = int_to_ptr.hbm [resolvable:$true] %s412_s26 }
  0x1b   : > { %s395_s18 = sshll.u32 %s1982_s4, 4  ;;  %s397_s28 = sshll.u32 %s1659_s12, 4  ;;  %s396_s18 = int_to_ptr.hbm [resolvable:$true] %s395_s18  ;;  %s398_s28 = int_to_ptr.vmem [resolvable:$true] %s397_s28 }
  0x1c   : > { %1286 = dma.hbm_to_vmem [thread:$0]  (!%p1783_p6), %s375_s19, 128, %s377_s23, [#allocation6], %s1657_s14, %s1657_s14, %s1658_s13  }
  0x1d   : > { %1292 = dma.hbm_to_vmem [thread:$0]  (!%p1783_p6), %s413_s26, 1024, %s415_s1, [#allocation9], %s1657_s14, %s1657_s14, %s1658_s13  }
  0x1e   : > { %1289 = dma.hbm_to_vmem [thread:$0]  (!%p1783_p6), %s396_s18, 64, %s398_s28, [#allocation6]  }
  0x1f   : > { %s429_s7 = sshll.u32 %s1983_s9, 4  ;;  %s1660_s19 = smov [#allocation10]   ;;  %s430_s7 = int_to_ptr.hbm [resolvable:$true] %s429_s7 }
  0x20   : > { %s431_s1 = sshll.u32 %s1660_s19, 4  ;;  %s1984_s11 = sld [smem:[#allocation24_spill]]  ;;  %s432_s1 = int_to_ptr.vmem [resolvable:$true] %s431_s1 }
  0x21   : > { %1295 = dma.hbm_to_vmem [thread:$0]  (!%p1783_p6), %s430_s7, 1024, %s432_s1, [#allocation9], %s1657_s14, %s1657_s14, %s1658_s13  }
  0x22   : > { %s1661_s12 = smov [#allocation11]   ;;  %s1107_s18 = sadd.s32 4294967294, %s1653_s16  }
  0x23   : > { %s448_s22 = sshll.u32 %s1661_s12, 4  ;;  %s1808_s24 = sadd.s32 1, %s1653_s16   ;;  %s449_s22 = int_to_ptr.vmem [resolvable:$true] %s448_s22 }
  0x24   : > { %s40_s25 = sadd.s32 1, %s1649_s15  ;;  %s37_s28 = ssub.s32 %s1653_s16, %s1808_s24 }
  0x25   : > { %p47_p7 = scmp.ne.s32.totalorder %s1649_s15, %s1645_s30  ;;  %p38_p8 = scmp.eq.s32.totalorder %s37_s28, 0 }
  0x26   : > { %s446_s17 = sshll.u32 %s1984_s11, 4  ;;  %p48_p9 = scmp.eq.s32.totalorder %s1653_s16, 0  ;;  %s447_s17 = int_to_ptr.hbm [resolvable:$true] %s446_s17 }
  0x27   : > { %1298 = dma.hbm_to_vmem [thread:$0]  (!%p1783_p6), %s447_s17, 1024, %s449_s22, [#allocation12], %s1657_s14, %s1657_s14, %s1658_s13  }
  0x28   : > { %p53_p10 = scmp.ne.s32.totalorder %s1645_s30, %s1641_s29  ;;  %p350_p11 = scmp.eq.s32.totalorder %s1766_s20, 1 }
  0x29   : > { %s1820_s7 = scalar_select %p38_p8, %s1649_s15, %s40_s25  }
  0x2a   : > { %p1822_p12 = por %p48_p9, %p47_p7  ;;  %p1828_p13 = por %p54_p1, %p53_p10 }
  0x2b   : > { %1985 = sst [smem:[#allocation19_spill]] %s1820_s7  ;;  %p1832_p0 = por %p350_p11, %p47_p7 }
  0x2c   : > { %p356_p2 = scmp.eq.s32.totalorder %s1107_s18, 1  ;;  %p1312_p4 = scmp.lt.s32.totalorder %s1653_s16, 2 }
  0x2d   : > { %s468_s27 = sand.u32 1, %s1649_s15   ;;  %s1232_s26 = sshll.u32 %s1653_s16, 4 }
  0x2e   : > { %p1838_p6 = por %p356_p2, %p53_p10  ;;  %s1115_s23 = sshll.u32 %s468_s27, 4 }
  0x2f   : > { %s477_s22 = scalar_lea.hbm %s1954_s0, %s1232_s26  ;;  %s472_s28 = scalar_lea.vmem [#allocation2], %s1115_s23 }
  0x30   : > { %s478_s25 = sshll.u32 %s477_s22, 4  ;;  %s480_s4 = sshll.u32 %s472_s28, 4  ;;  %s479_s25 = int_to_ptr.hbm [resolvable:$true] %s478_s25  ;;  %s481_s4 = int_to_ptr.vmem [resolvable:$true] %s480_s4 }
  0x31   : > { %p1848_p7 = pnand %p1312_p4, %p1822_p12  ;;  %s469_s9 = scalar_lea.sflag [#allocation3], %s468_s27 }
  0x32   : > { %s1545_s11 = sshra.s32 %s479_s25, 4  ;;  %s1552_s17 = scalar_lea.hbm %s1954_s0, 32  ;;  %s1546_s11 = int_to_ptr.hbm [resolvable:$true] %s1545_s11 }
  0x33   : > { %s1547_s7 = scalar_lea.hbm %s1546_s11, 16  ;;  %p1549_p9 = pneg %p1848_p7 }
  0x34   : > { %p1548_p8 = scmp.ne.s32.totalorder %s1546_s11, %s1547_s7  ;;  %p1553_p12 = scmp.lt.s32.totalorder %s1546_s11, %s1954_s0 }
  0x35   : > { %p1554_p2 = scmp.lt.s32.totalorder %s1552_s17, %s1547_s7 }
  0x36   : > { %p1550_p10 = pnand %p1549_p9, %p1548_p8 }
  0x37   : > { %p1555_p4 = por %p1554_p2, %p1553_p12 }
  0x38   : > { %p1551_p11 = pneg %p1550_p10 }
  0x3a   : > { %p1556_p5 = pnand %p1555_p4, %p1551_p11 }
  0x3c   : > { %1559 = shalt.err (!%p1556_p5)
}
  0x3d   : > { %s1662_s27 = smov 128   ;;  %s1663_s22 = smov 8  }
  0x3e   : > { %1302 = dma.hbm_to_vmem [thread:$0]  (!%p1848_p7), %s479_s25, 256, %s481_s4, %s469_s9, %s1662_s27, %s1662_s27, %s1663_s22  }
  0x3f   : > { %492 = sbr.rel (%p1771_p3) target bundleno = 753 (0x2f1), region = 76  ;;  %s1865_s28 = sand.u32 (!%p1771_p3), 1, %s1645_s30  }
  0x40   : > { %s1119_s11 = sshll.u32 (!%p1771_p3), %s1865_s28, 4  ;;  %s495_s7 = scalar_lea.sflag (!%p1771_p3), [#allocation3], %s1865_s28 }
  0x41   : > { %s498_s26 = scalar_lea.vmem (!%p1771_p3), [#allocation2], %s1119_s11 }
  0x44   : > { %1620 = dma.done.wait (%p1828_p13), %s495_s7, 256  }
  0x45   : > { %1622 = vsyncadd (%p1828_p13), %s495_s7, 4294967040 }
  0x46   : > { %1624 = dma.done.wait (%p54_p1), [#allocation6], 192  }
  0x47   : > { %1626 = vsyncadd (%p54_p1), [#allocation6], 4294967104 }
  0x48   : > { %1628 = dma.done.wait (%p54_p1), [#allocation9], 2048  }
  0x49   : > { %1630 = vsyncadd (%p54_p1), [#allocation9], 4294965248 }
  0x4a   : > { %1632 = dma.done.wait (%p54_p1), [#allocation12], 1024  }
  0x4b   : > { %1634 = vsyncadd (%p54_p1), [#allocation12], 4294966272  ;;  %v1233_v0 = vld [vmem:[#allocation5] sm:$0xff]  ;;  %v571_v2 = vld [vmem:[%s498_s26 + $0x8] sm:$0xff]  ;;  %vm581_vm0 = vcmask 130048   ;;  %v624_v21 = vlaneseq  ;;  %s1991_s4 = sld [smem:[#allocation25_spill]] }
  0x4c   : > { %v570_v1 = vld [vmem:[%s498_s26] sm:$0xff]  ;;  %592 = vmatpush.bf16.msra.mxu0 %v1233_v0  ;;  %v623_v28 = vld [vmem:[#allocation7] sm:$0x7]  ;;  %s1992_s13 = sld [smem:[#allocation26_spill]]  ;;  %s1258_s25 = sshll.u32 %s1766_s20, 4 }
  0x4d   : > { %v572_v3 = vpack.c.bf16 %v571_v2, %v570_v1  ;;  %v1363_v4 = vld [vmem:[%s1956_s2] ss:$0 sm:$0xff]  ;;  %v1241_v14 = vld [vmem:[#allocation8 + $0x38] sm:$0xff]  ;;  %v1239_v20 = vld [vmem:[#allocation8 + $0x28] sm:$0xff]  ;;  %v625_v25 = vshrl.u32 %v624_v21, 7  ;;  %v627_v33 = vperm.slane %v623_v28, 1 }
  0x4e   : > { %v1364_v5 = vld [vmem:[%s1957_s3] ss:$0 sm:$0xff]  ;;  %771 = vmatpush.bf16.msra.mxu1 %v1241_v14  ;;  %v1238_v22 = vld [vmem:[#allocation8 + $0x20] sm:$0xff]  ;;  %v1237_v26 = vld [vmem:[#allocation8 + $0x18] sm:$0xff]  ;;  %v661_v34 = vperm.slane %v623_v28, 2  ;;  %v643_v36 = vperm.slane %v623_v28, 0 }
  0x4f   : > { %1130 = vmatmul.msk.bf16.vlgmr.msra.gmra.mxu0 %vm581_vm0, %v572_v3  ;;  %v1240_v16 = vld [vmem:[#allocation8 + $0x30] sm:$0xff]  ;;  %v626_v29 = vadd.s32 8, %v625_v25  ;;  %vm632_vm1 = vcmp.lt.s32.totalorder %v625_v25, 1  ;;  %vm635_vm2 = vcmp.ge.s32.totalorder %v625_v25, 1  ;;  %vm650_vm3 = vcmp.lt.s32.totalorder %v625_v25, 7  ;;  %v1235_v37 = vld [vmem:[#allocation8 + $0x8] sm:$0xff] }
  0x50   : > { %v1236_v30 = vld [vmem:[#allocation8 + $0x10] sm:$0xff]  ;;  %v1234_v50 = vld [vmem:[#allocation8] sm:$0xff]  ;;  %s1993_s17 = sld [smem:[#allocation27_spill]]  ;;  %s568_s19 = scalar_lea.vmem [#allocation13], %s1119_s11 }
  0x51   : > { %vm654_vm4 = vcmp.lt.s32.totalorder %v626_v29, 15  ;;  %v1365_v55 = vld [vmem:[%s1959_s5] ss:$0 sm:$0xff]  ;;  %s983_s27 = sshll.u32 %s568_s19, 4  ;;  %s971_s7 = scalar_lea.sflag [#allocation4], %s1865_s28  ;;  %s984_s27 = int_to_ptr.vmem [resolvable:$true] %s983_s27 }
  0x52   : > { %772 = vmatpush.bf16.msra.mxu1 %v1240_v16  ;;  %v1366_v59 = vld [vmem:[%s1960_s6] ss:$0 sm:$0xff] }
  0x56   : > { %773 = vmatpush.bf16.msra.mxu1 %v1239_v20  ;;  %s982_s12 = scalar_lea.hbm %s1993_s17, %s1258_s25  ;;  %s1595_s11 = scalar_lea.hbm %s1993_s17, 32 }
  0x57   : > { %s985_s22 = sshll.u32 %s982_s12, 4  ;;  %s986_s22 = int_to_ptr.hbm [resolvable:$true] %s985_s22 }
  0x58   : > { %s1589_s26 = sshra.s32 %s986_s22, 4  ;;  %s1590_s26 = int_to_ptr.hbm [resolvable:$true] %s1589_s26 }
  0x59   : > { %s1591_s20 = scalar_lea.hbm %s1590_s26, 16  ;;  %p1596_p13 = scmp.lt.s32.totalorder %s1590_s26, %s1993_s17 }
  0x5a   : > { %774 = vmatpush.bf16.msra.mxu1 %v1238_v22  ;;  %p1592_p1 = scmp.ne.s32.totalorder %s1590_s26, %s1591_s20  ;;  %p1597_p7 = scmp.lt.s32.totalorder %s1595_s11, %s1591_s20 }
  0x5c   : > { %p1593_p3 = pnand %p1592_p1, %p1832_p0  ;;  %p1598_p8 = por %p1597_p7, %p1596_p13 }
  0x5e   : > { %775 = vmatpush.bf16.msra.mxu1 %v1237_v26  ;;  %p1594_p5 = pneg %p1593_p3 }
  0x60   : > { %p1599_p9 = pnand %p1598_p8, %p1594_p5 }
  0x62   : > { %776 = vmatpush.bf16.msra.mxu1 %v1236_v30  ;;  %v1248_v30 = vld [vmem:[#allocation10 + $0x30] sm:$0xff] }
  0x66   : > { %777 = vmatpush.bf16.msra.mxu1 %v1235_v37  ;;  %v1257_v37 = vld [vmem:[#allocation11 + $0x38] sm:$0xff] }
  0x67   : > { %942 = vmatpush.bf16.msra.mxu3 %v1257_v37 }
  0x6a   : > { %778 = vmatpush.bf16.msra.mxu1 %v1234_v50  ;;  %v1255_v50 = vld [vmem:[#allocation11 + $0x28] sm:$0xff] }
  0xcc   : > { %v594_v6 = vpop.f32.mrf.mxu0 }
  0xcd   : > { %v603_v7 = vmul.f32 %v1363_v4, %v594_v6  ;;  %v1249_v6 = vld [vmem:[#allocation10 + $0x38] sm:$0xff] }
  0xce   : > { %856 = vmatpush.bf16.msra.mxu2 %v1249_v6  ;;  %v1368_v6 = vld [vmem:[%s1992_s13] ss:$0 sm:$0xff] }
  0xcf   : > { %v609_v8 = vadd.f32 %v1364_v5, %v603_v7 }
  0xd1   : > { %v611_v9 = vsub.f32 0.0, %v609_v8 }
  0xd2   : > { %857 = vmatpush.bf16.msra.mxu2 %v1248_v30 }
  0xd3   : > { %v613_v10 = vmul.f32 1.442695, %v611_v9 }
  0xd4   : > { %v596_v11 = vpop.f32.mrf.mxu0 }
  0xd5   : > { %1369 = vpow2.f32 %v613_v10  ;;  %v604_v12 = vmul.f32 %v1363_v4, %v596_v11 }
  0xd7   : > { %v610_v13 = vadd.f32 %v1364_v5, %v604_v12  ;;  %v1664_v5 = vmov 16.0  }
  0xd9   : > { %v612_v15 = vsub.f32 0.0, %v610_v13 }
  0xdb   : > { %v1370_v17 = vpop.eup %1369  ;;  %v615_v18 = vmul.f32 1.442695, %v612_v15 }
  0xdc   : > { %v617_v19 = vadd.f32 1.0, %v1370_v17 }
  0xdd   : > { %1371 = vpow2.f32 %v615_v18 }
  0xde   : > { %1373 = vrcp.f32 %v617_v19 }
  0xe3   : > { %v1372_v23 = vpop.eup %1371 }
  0xe4   : > { %v618_v24 = vadd.f32 1.0, %v1372_v23  ;;  %v1374_v27 = vpop.eup %1373 }
  0xe5   : > { %v621_v31 = vmul.f32 %v1374_v27, %v609_v8 }
  0xe6   : > { %1375 = vrcp.f32 %v618_v24 }
  0xe7   : > { %v630_v38 = vrot.slane %v621_v31, 7  ;;  %v648_v39 = vrot.slane %v621_v31, 1  ;;  %v628_v51 = vmul.f32 %v627_v33, %v621_v31  ;;  %v1247_v31 = vld [vmem:[#allocation10 + $0x28] sm:$0xff] }
  0xe8   : > { %858 = vmatpush.bf16.msra.mxu2 %v1247_v31 }
  0xec   : > { %v1376_v32 = vpop.eup %1375 }
  0xed   : > { %v622_v35 = vmul.f32 %v1376_v32, %v610_v13  ;;  %v1246_v32 = vld [vmem:[#allocation10 + $0x20] sm:$0xff] }
  0xee   : > { %859 = vmatpush.bf16.msra.mxu2 %v1246_v32 }
  0xef   : > { %v631_v40 = vrot.slane %v622_v35, 7  ;;  %v649_v41 = vrot.slane %v622_v35, 1  ;;  %v629_v42 = vmul.f32 %v627_v33, %v622_v35  ;;  %v1245_v33 = vld [vmem:[#allocation10 + $0x18] sm:$0xff]  ;;  %v1243_v35 = vld [vmem:[#allocation10 + $0x8] sm:$0xff] }
  0xf1   : > { %v633_v43 = vsel %vm632_vm1, %v630_v38, %v631_v40  ;;  %v634_v44 = vsel %vm632_vm1, %v631_v40, %v630_v38  ;;  %v652_v45 = vsel %vm650_vm3, %v649_v41, %v648_v39  ;;  %v651_v48 = vsel %vm650_vm3, %v648_v39, %v649_v41  ;;  %v722_v38 = vld [vmem:[%s1962_s8] sm:$0x1] }
  0xf2   : > { %v641_v46 = vsel %vm635_vm2, %v634_v44, 0.0  ;;  %v645_v47 = vmul.f32 %v643_v36, %v633_v43  ;;  %v660_v49 = vsel %vm654_vm4, %v652_v45, 0.0  ;;  %v662_v57 = vmul.f32 %v661_v34, %v651_v48  ;;  %860 = vmatpush.bf16.msra.mxu2 %v1245_v33 }
  0xf3   : > { %v644_v52 = vmul.f32 %v643_v36, %v641_v46  ;;  %v663_v53 = vmul.f32 %v661_v34, %v660_v49  ;;  %v1244_v34 = vld [vmem:[#allocation10 + $0x10] sm:$0xff]  ;;  %v1242_v36 = vld [vmem:[#allocation10] sm:$0xff] }
  0xf4   : > { %v647_v54 = vadd.f32 %v645_v47, %v629_v42  ;;  %v1256_v49 = vld [vmem:[#allocation11 + $0x30] sm:$0xff] }
  0xf5   : > { %v646_v56 = vadd.f32 %v644_v52, %v628_v51  ;;  %943 = vmatpush.bf16.msra.mxu3 %v1256_v49  ;;  %v1254_v51 = vld [vmem:[#allocation11 + $0x20] sm:$0xff]  ;;  %v1253_v52 = vld [vmem:[#allocation11 + $0x18] sm:$0xff] }
  0xf6   : > { %v665_v58 = vadd.f32 %v663_v53, %v647_v54  ;;  %861 = vmatpush.bf16.msra.mxu2 %v1244_v34  ;;  %v1252_v53 = vld [vmem:[#allocation11 + $0x10] sm:$0xff]  ;;  %v1251_v54 = vld [vmem:[#allocation11 + $0x8] sm:$0xff] }
  0xf7   : > { %v664_v60 = vadd.f32 %v662_v57, %v646_v56  ;;  %v807_v56 = vld [vmem:[%s1964_s10] sm:$0x1] }
  0xf8   : > { %v671_v61 = vmul.f32 %v1365_v55, %v665_v58 }
  0xf9   : > { %v670_v62 = vmul.f32 %v1365_v55, %v664_v60  ;;  %944 = vmatpush.bf16.msra.mxu3 %v1255_v50  ;;  %v1250_v55 = vld [vmem:[#allocation11] sm:$0xff] }
  0xfa   : > { %v677_v63 = vadd.f32 %v1366_v59, %v671_v61  ;;  %862 = vmatpush.bf16.msra.mxu2 %v1243_v35 }
  0xfb   : > { %v676_v0 = vadd.f32 %v1366_v59, %v670_v62 }
  0xfc   : > { %v679_v1 = vsub.f32 0.0, %v677_v63 }
  0xfd   : > { %v678_v2 = vsub.f32 0.0, %v676_v0  ;;  %945 = vmatpush.bf16.msra.mxu3 %v1254_v51 }
  0xfe   : > { %v682_v3 = vmul.f32 1.442695, %v679_v1  ;;  %863 = vmatpush.bf16.msra.mxu2 %v1242_v36 }
  0xff   : > { %v680_v4 = vmul.f32 1.442695, %v678_v2 }
 0x100   : > { %1377 = vpow2.f32 %v682_v3 }
 0x101   : > { %1379 = vpow2.f32 %v680_v4  ;;  %946 = vmatpush.bf16.msra.mxu3 %v1253_v52 }
 0x102   : > { %1381 = vrcp.f32 %v1664_v5  ;;  %v1367_v5 = vld [vmem:[%s1991_s4] ss:$0 sm:$0xff] }
 0x105   : > { %947 = vmatpush.bf16.msra.mxu3 %v1252_v53 }
 0x106   : > { %v1378_v7 = vpop.eup %1377 }
 0x107   : > { %v1380_v8 = vpop.eup %1379  ;;  %v685_v9 = vadd.f32 1.0, %v1378_v7 }
 0x108   : > { %v684_v10 = vadd.f32 1.0, %v1380_v8  ;;  %v1382_v11 = vpop.eup %1381 }
 0x109   : > { %1383 = vrcp.f32 %v685_v9  ;;  %v698_v12 = vmul.f32 16.0, %v1382_v11  ;;  %vm702_vm5 = vweird.f32 %v1382_v11  ;;  %948 = vmatpush.bf16.msra.mxu3 %v1251_v54 }
 0x10a   : > { %1385 = vrcp.f32 %v684_v10 }
 0x10b   : > { %v699_v17 = vsub.f32 1.0, %v698_v12 }
 0x10d   : > { %v700_v20 = vmul.f32 %v1382_v11, %v699_v17  ;;  %949 = vmatpush.bf16.msra.mxu3 %v1250_v55 }
 0x10f   : > { %v1384_v13 = vpop.eup %1383  ;;  %v701_v23 = vadd.f32 %v1382_v11, %v700_v20 }
 0x110   : > { %v1386_v14 = vpop.eup %1385  ;;  %v1899_v15 = vmul.f32 %v1384_v13, %v677_v63 }
 0x111   : > { %v1901_v16 = vmul.f32 %v1386_v14, %v676_v0  ;;  %v703_v26 = vsel %vm702_vm5, %v1382_v11, %v701_v23 }
 0x113   : > { %v690_v18 = vadd.f32 %v1899_v15, %v1901_v16 }
 0x115   : > { %v691_v19 = vrot.slane %v690_v18, 4 }
 0x117   : > { %v692_v21 = vadd.f32 %v691_v19, %v690_v18 }
 0x119   : > { %v693_v22 = vrot.slane %v692_v21, 2 }
 0x11b   : > { %v694_v24 = vadd.f32 %v693_v22, %v692_v21 }
 0x11d   : > { %v695_v25 = vrot.slane %v694_v24, 1 }
 0x11f   : > { %v696_v27 = vadd.f32 %v695_v25, %v694_v24 }
 0x121   : > { %v704_v28 = vmul.f32 %v703_v26, %v696_v27 }
 0x123   : > { %v705_v29 = vpack.c.bf16 %v704_v28, %v704_v28 }
 0x125   : > { %779 = vmatmul.bf16.vlgmr.msra.gmra.mxu1 %v705_v29 }
 0x1a2   : > { %v780_v39 = vpop.f32.mrf.mxu1 }
 0x1a3   : > { %v781_v40 = vadd.f32 %v780_v39, %v722_v38 }
 0x1a5   : > { %v784_v41 = vsub.f32 0.0, %v781_v40 }
 0x1a7   : > { %v785_v42 = vmul.f32 1.442695, %v784_v41 }
 0x1a9   : > { %1387 = vpow2.f32 %v785_v42 }
 0x1aa   : > { %v782_v43 = vpop.f32.mrf.mxu1 }
 0x1af   : > { %v1388_v44 = vpop.eup %1387 }
 0x1b0   : > { %v787_v45 = vadd.f32 1.0, %v1388_v44 }
 0x1b2   : > { %1389 = vrcp.f32 %v787_v45 }
 0x1b8   : > { %v1390_v46 = vpop.eup %1389 }
 0x1b9   : > { %v789_v47 = vmul.f32 %v1390_v46, %v781_v40 }
 0x1bb   : > { %v790_v48 = vpack.c.bf16 %v789_v47, %v789_v47 }
 0x1bd   : > { %864 = vmatmul.bf16.vlgmr.msra.gmra.mxu2 %v790_v48 }
 0x240   : > { %v865_v57 = vpop.f32.mrf.mxu2 }
 0x241   : > { %v866_v58 = vadd.f32 %v865_v57, %v807_v56 }
 0x243   : > { %v869_v59 = vsub.f32 0.0, %v866_v58 }
 0x245   : > { %v870_v60 = vmul.f32 1.442695, %v869_v59 }
 0x247   : > { %1391 = vpow2.f32 %v870_v60 }
 0x248   : > { %v867_v61 = vpop.f32.mrf.mxu2 }
 0x24d   : > { %v1392_v62 = vpop.eup %1391 }
 0x24e   : > { %v872_v63 = vadd.f32 1.0, %v1392_v62 }
 0x250   : > { %1393 = vrcp.f32 %v872_v63 }
 0x256   : > { %v1394_v0 = vpop.eup %1393 }
 0x257   : > { %v874_v1 = vperm.slane %v1394_v0, 0 }
 0x259   : > { %v875_v2 = vmul.f32 %v874_v1, %v1901_v16  ;;  %v876_v3 = vmul.f32 %v874_v1, %v1899_v15 }
 0x25b   : > { %v877_v4 = vpack.c.bf16 %v876_v3, %v875_v2 }
 0x25d   : > { %950 = vmatmul.bf16.vlgmr.msra.gmra.mxu3 %v877_v4 }
 0x2e0   : > { %v951_v7 = vpop.f32.mrf.mxu3 }
 0x2e1   : > { %v960_v8 = vmul.f32 %v1367_v5, %v951_v7 }
 0x2e3   : > { %v966_v9 = vadd.f32 %v1368_v6, %v960_v8 }
 0x2e5   : > { %968 = vst [vmem:[%s568_s19] sm:$0xff] %v966_v9 }
 0x2e8   : > { %v953_v10 = vpop.f32.mrf.mxu3 }
 0x2e9   : > { %v961_v11 = vmul.f32 %v1367_v5, %v953_v10 }
 0x2eb   : > { %v967_v12 = vadd.f32 %v1368_v6, %v961_v11 }
 0x2ed   : > { %969 = vst [vmem:[%s568_s19 + $0x8] sm:$0xff] %v967_v12 }
 0x2ee   : > { %1602 = shalt.err (!%p1599_p9)
}
 0x2ef   : > { %s1665_s28 = smov 128   ;;  %s1666_s25 = smov 8  }
 0x2f0   : > { %1281 = dma.vmem_to_hbm [thread:$0]  (%p1832_p0), %s984_s27, 256, %s986_s22, %s971_s7, %s1665_s28, %s1665_s28, %s1666_s25  }
 0x2f1 PF: > { %s1000_s18 = sand.u32 1, %s1641_s29   ;;  %p1994_p10 = scmp.ge.s32.totalorder %s1653_s16, 2 }
 0x2f2   : > { %s1001_s23 = scalar_lea.sflag [#allocation4], %s1000_s18 }
 0x2f3   : > { %p1304_p11 = pnand %p1994_p10, %p1838_p6 }
 0x2f5   : > { %p1305_p12 = pneg %p1304_p11 }
 0x2f7   : > { %1636 = dma.done.wait (%p1305_p12), %s1001_s23, 256  }
 0x2f8   : > { %1638 = vsyncadd (%p1305_p12), %s1001_s23, 4294967040  ;;  %s1995_s12 = sld [smem:[#allocation19_spill]]  ;;  %p30_p2 = scmp.ge.s32.totalorder %s1808_s24, 4  }
 0x2f9   : > { %s1996_s29 = smov %s1645_s30  ;;  %s1997_s30 = smov %s1649_s15 }
 0x2fa   : > { %s1999_s16 = smov %s1808_s24  ;;  %32 = sbr.rel (!%p30_p2) target bundleno = 17 (0x11), region = 141 }
 0x2fe   : > { %s1998_s15 = smov %s1995_s12 }
 0x2ff   :  { %1007 = vsyncpa [#allocation3], 1 }
 0x300   :  { %1009 = vsyncpa [#allocation3 + $0x1], 1 }
 0x301   :  { %1010 = vsyncpa [#allocation6], 1 }
 0x302   :  { %1011 = vsyncpa [#allocation9], 1 }
 0x303   :  { %1012 = vsyncpa [#allocation12], 1 }
 0x304   :  { %1013 = vsyncpa [#allocation4], 1 }
 0x305   :  { %1015 = vsyncpa [#allocation4 + $0x1], 1 }

</bundles_post_ra>
